<compile_context>
chip_gen: v6e
topology: v6e:2x2x1
jax: 0.10.0
libtpu: 0.0.40
codegen_flags: <defaults>
</compile_context>

<pallas_src>
import functools

import jax
import jax.numpy as jnp
import numpy as np
from jax.experimental import pallas as pl
from jax.experimental.pallas import tpu as pltpu


def _round_up(x, m):
    return (x + m - 1) // m * m


def _pick_tile(target, n_align):
    """Largest power-of-two multiple of 128 that is <= min(target, n_align)."""
    t = 128
    while t * 2 <= min(target, n_align):
        t *= 2
    return t


def _vmem_limit_bytes():
    """Per-generation scoped-VMEM limit: 64 MiB on v5e/v6e, 32 MiB on v7x."""
    cap = 64 * 1024 * 1024  # v7x physical -> safe fallback
    try:
        info = pltpu.get_tpu_info()
        cap = int(getattr(info, "vmem_capacity_bytes", cap))
    except Exception:
        pass
    return int(min(cap // 2, 96 * 1024 * 1024))


# --------------------------------------------------------------------------
# Prologue kernel: x = seq @ W + b   (stored in matmul dtype, bf16)
# --------------------------------------------------------------------------
def gcn_linear_kernel(seq_ref, w_ref, b_ref, x_ref):
    x = jnp.dot(seq_ref[...], w_ref[...], preferred_element_type=jnp.float32)
    x_ref[...] = (x + b_ref[...]).astype(x_ref.dtype)


# --------------------------------------------------------------------------
# Main kernel: out = ELU(prompt * PReLU(adj @ x, alpha))
# grid = (rows, K-reduction); reduction last; accumulate directly into the
# VMEM-resident output block (its index map ignores k).
# --------------------------------------------------------------------------
def lp_kernel(alpha_ref, adj_ref, x_ref, prompt_ref, out_ref, *, tk, x_resident):
    k = pl.program_id(1)

    @pl.when(k == 0)
    def _():
        out_ref[...] = jnp.zeros_like(out_ref)

    if x_resident:
        # x is fully VMEM-resident; pick the current K panel in-kernel.
        x_k = x_ref[pl.ds(pl.multiple_of(k * tk, tk), tk), :]
    else:
        x_k = x_ref[...]

    out_ref[...] += jnp.dot(adj_ref[...], x_k,
                            preferred_element_type=jnp.float32)

    @pl.when(k == pl.num_programs(1) - 1)
    def _():
        alpha = alpha_ref[0, 0]                       # PReLU slope (SMEM scalar)
        h = out_ref[...]
        h = jnp.where(h > 0, h, alpha * h)            # PReLU
        ret = h * prompt_ref[...]                     # prompt modulation
        # ELU (alpha = 1). Clamp exp arg: where evaluates both branches.
        out_ref[...] = jnp.where(
            ret > 0, ret, jnp.exp(jnp.minimum(ret, 0.0)) - 1.0)


# --------------------------------------------------------------------------
# Wrapper
# --------------------------------------------------------------------------
def lp_forward(seq, adj, w, b, prompt, prelu_alpha=0.25, *,
               tm_target=512, tk_target=2048, matmul_dtype=jnp.bfloat16,
               x_resident_max_bytes=6 * 1024 * 1024):
    """seq: (1, N, n_in) or (N, n_in); adj: (N, N) dense. Returns (N, n_h) f32.

    adj may also be passed already cast to `matmul_dtype` and padded to the
    (rows_pad, k_pad) tile grid (it is static across GNN steps); in that case
    the cast/pad pass is skipped.
    """
    if seq.ndim == 3:
        seq = seq[0]                                  # squeeze batch-of-1 (glue)
    N, n_in = seq.shape
    n_h = w.shape[1]

    # Lane-dense feature padding; rows / K padded independently to tm / tk.
    h_pad = _round_up(n_h, 128)
    in_pad = _round_up(n_in, 128)
    n_align = _round_up(N, 128)
    tm = _pick_tile(tm_target, n_align)
    tk = max(tm, _pick_tile(tk_target, n_align))      # tm | tk | k_pad
    rows_pad = _round_up(N, tm)
    k_pad = _round_up(N, tk)

    vmem_limit = _vmem_limit_bytes()

    # adj: single cast + single pad (dominant HBM stream; hoistable by caller).
    adj_m = adj if adj.dtype == matmul_dtype else adj.astype(matmul_dtype)
    if adj_m.shape == (rows_pad, k_pad):
        adj_p = adj_m
    else:
        adj_p = jnp.pad(adj_m, ((0, rows_pad - N), (0, k_pad - N)))

    seq_p = jnp.pad(seq.astype(matmul_dtype),
                    ((0, k_pad - N), (0, in_pad - n_in)))
    w_p = jnp.pad(w.astype(matmul_dtype),
                  ((0, in_pad - n_in), (0, h_pad - n_h)))
    b_p = jnp.pad(b.astype(jnp.float32), ((0, 0), (0, h_pad - n_h)))
    prompt_p = jnp.pad(prompt.astype(jnp.float32), ((0, 0), (0, h_pad - n_h)))
    alpha_arr = jnp.full((1, 1), prelu_alpha, dtype=jnp.float32)

    # ---- prologue: x = seq @ W + b, row-tiled, stored bf16 for the adj matmul
    x = pl.pallas_call(
        gcn_linear_kernel,
        out_shape=jax.ShapeDtypeStruct((k_pad, h_pad), matmul_dtype),
        grid=(k_pad // tm,),
        in_specs=[
            pl.BlockSpec((tm, in_pad), lambda i: (i, 0)),
            pl.BlockSpec((in_pad, h_pad), lambda i: (0, 0)),
            pl.BlockSpec((1, h_pad), lambda i: (0, 0)),
        ],
        out_specs=pl.BlockSpec((tm, h_pad), lambda i: (i, 0)),
        compiler_params=pltpu.CompilerParams(
            dimension_semantics=("parallel",),
            vmem_limit_bytes=vmem_limit),
    )(seq_p, w_p, b_p)

    # ---- main: row-parallel / K-reduction adj @ x with fused epilogue.
    # Keep x fully VMEM-resident when it fits (fetched from HBM once);
    # otherwise stream it as K panels.
    x_bytes = k_pad * h_pad * jnp.dtype(matmul_dtype).itemsize
    x_resident = x_bytes <= x_resident_max_bytes
    if x_resident:
        x_spec = pl.BlockSpec((k_pad, h_pad), lambda i, k: (0, 0))
    else:
        x_spec = pl.BlockSpec((tk, h_pad), lambda i, k: (k, 0))

    kernel = functools.partial(lp_kernel, tk=tk, x_resident=x_resident)

    out = pl.pallas_call(
        kernel,
        out_shape=jax.ShapeDtypeStruct((rows_pad, h_pad), jnp.float32),
        grid=(rows_pad // tm, k_pad // tk),
        in_specs=[
            pl.BlockSpec(memory_space=pltpu.MemorySpace.SMEM),   # alpha scalar
            pl.BlockSpec((tm, tk), lambda i, k: (i, k)),         # adj tile
            x_spec,                                              # x (resident/panel)
            pl.BlockSpec((1, h_pad), lambda i, k: (0, 0)),       # prompt
        ],
        out_specs=pl.BlockSpec((tm, h_pad), lambda i, k: (i, 0)),
        compiler_params=pltpu.CompilerParams(
            dimension_semantics=("parallel", "arbitrary"),
            vmem_limit_bytes=vmem_limit),
    )(alpha_arr, adj_p, x, prompt_p)

    return out[:N, :n_h]


# --------------------------------------------------------------------------
# Pure-JAX reference (f32 everywhere)
# --------------------------------------------------------------------------
def reference_forward(seq, adj, w, b, prompt, prelu_alpha=0.25):
    if seq.ndim == 3:
        seq = seq[0]
    x = seq @ w + b
    h = adj @ x
    h = jnp.where(h > 0, h, prelu_alpha * h)
    ret = h * prompt
    return jnp.where(ret > 0, ret, jnp.exp(jnp.minimum(ret, 0.0)) - 1.0)


def _make_inputs(key, N, n_in, n_h):
    k_seq, k_adj, k_w, k_prompt = jax.random.split(key, 4)
    seq = jax.random.normal(k_seq, (1, N, n_in), dtype=jnp.float32)
    adj_raw = jax.random.uniform(k_adj, (N, N), dtype=jnp.float32)
    adj = (adj_raw > 0.7).astype(jnp.float32) + jnp.eye(N, dtype=jnp.float32)
    adj = adj / jnp.sum(adj, axis=1, keepdims=True)   # row-normalized
    w_bound = np.sqrt(6.0 / (n_in + n_h))
    w = jax.random.uniform(k_w, (n_in, n_h), minval=-w_bound, maxval=w_bound,
                           dtype=jnp.float32)
    b = jnp.zeros((1, n_h), dtype=jnp.float32)
    p_bound = np.sqrt(6.0 / (1 + n_h))
    prompt = jax.random.uniform(k_prompt, (1, n_h), minval=-p_bound,
                                maxval=p_bound, dtype=jnp.float32)
    return seq, adj, w, b, prompt


if __name__ == "__main__":
    key = jax.random.PRNGKey(0)
    k1, k2 = jax.random.split(key)

    # Case 1: toy shapes from the module (N=64 nodes, n_in=32, n_h=32).
    # Case 2: larger N to exercise the row-parallel + K-reduction grid.
    for k, (N, n_in, n_h) in ((k1, (64, 32, 32)), (k2, (320, 32, 32))):
        seq, adj, w, b, prompt = _make_inputs(k, N, n_in, n_h)
        out = lp_forward(seq, adj, w, b, prompt)
        jax.block_until_ready(out)
        ref = reference_forward(seq, adj, w, b, prompt)
        # adj / x / seq are streamed in bf16 (f32 accumulation) -> loose
        # tolerance vs the pure-f32 reference.
        np.testing.assert_allclose(np.asarray(out), np.asarray(ref),
                                   rtol=5e-2, atol=2e-2)

    print("KERNEL_OK")
</pallas_src>

<mosaic_0001>
module attributes {stable_mosaic.version = 11 : i64} {
  func.func @gcn_linear_kernel(%arg0: i32, %arg1: memref<128x128xbf16, #tpu.memory_space<vmem>>, %arg2: memref<128x128xbf16, #tpu.memory_space<vmem>>, %arg3: memref<1x128xf32, #tpu.memory_space<vmem>>, %arg4: memref<128x128xbf16, #tpu.memory_space<vmem>>) attributes {dimension_semantics = [#tpu.dimension_semantics<parallel>], iteration_bounds = array<i64: 1>, scalar_prefetch = 0 : i64, scratch_operands = 0 : i64, tpu.core_type = #tpu.core_type<tc>, window_params = [{transform_indices = @transform_0, window_bounds = array<i64: 128, 128>}, {pipeline_mode = #tpu.pipeline_mode<synchronous>, transform_indices = @transform_1, window_bounds = array<i64: 128, 128>}, {pipeline_mode = #tpu.pipeline_mode<synchronous>, transform_indices = @transform_2, window_bounds = array<i64: 1, 128>}, {transform_indices = @transform_3, window_bounds = array<i64: 128, 128>}]} {
    %c0 = arith.constant 0 : index
    %c0_0 = arith.constant 0 : index
    %0 = vector.load %arg1[%c0, %c0_0] : memref<128x128xbf16, #tpu.memory_space<vmem>>, vector<128x128xbf16>
    %c0_1 = arith.constant 0 : index
    %c0_2 = arith.constant 0 : index
    %1 = vector.load %arg2[%c0_1, %c0_2] : memref<128x128xbf16, #tpu.memory_space<vmem>>, vector<128x128xbf16>
    %cst = arith.constant dense<0.000000e+00> : vector<128x128xf32>
    %2 = tpu.matmul %0, %1, %cst {dimension_numbers = #tpu.dot_dimension_numbers<[1], [0], [0], [1], [0, 0, 1, 1], [], []>} : vector<128x128xbf16>, vector<128x128xbf16>, vector<128x128xf32> -> vector<128x128xf32>
    %c0_3 = arith.constant 0 : index
    %c0_4 = arith.constant 0 : index
    %3 = vector.load %arg3[%c0_3, %c0_4] : memref<1x128xf32, #tpu.memory_space<vmem>>, vector<1x128xf32>
    %4 = vector.broadcast %3 : vector<1x128xf32> to vector<128x128xf32>
    %5 = arith.addf %2, %4 : vector<128x128xf32>
    %6 = arith.truncf %5 : vector<128x128xf32> to vector<128x128xbf16>
    %c0_5 = arith.constant 0 : index
    %c0_6 = arith.constant 0 : index
    %7 = vector.load %arg4[%c0_5, %c0_6] : memref<128x128xbf16, #tpu.memory_space<vmem>>, vector<128x128xbf16>
    tpu.vector_store %arg4[%c0_5, %c0_6], %6 {strides = array<i32>} : memref<128x128xbf16, #tpu.memory_space<vmem>>, vector<128x128xbf16>,
    return
  }
  func.func @transform_0(%arg0: i32) -> (i32, i32) {
    %c0_i32 = arith.constant 0 : i32
    %c0_i32_0 = arith.constant 0 : i32
    return %arg0, %c0_i32 : i32, i32
  }
  func.func @transform_1(%arg0: i32) -> (i32, i32) {
    %c0_i32 = arith.constant 0 : i32
    %c0_i32_0 = arith.constant 0 : i32
    %c0_i32_1 = arith.constant 0 : i32
    return %c0_i32, %c0_i32_0 : i32, i32
  }
  func.func @transform_2(%arg0: i32) -> (i32, i32) {
    %c0_i32 = arith.constant 0 : i32
    %c0_i32_0 = arith.constant 0 : i32
    %c0_i32_1 = arith.constant 0 : i32
    return %c0_i32, %c0_i32_0 : i32, i32
  }
  func.func @transform_3(%arg0: i32) -> (i32, i32) {
    %c0_i32 = arith.constant 0 : i32
    %c0_i32_0 = arith.constant 0 : i32
    return %arg0, %c0_i32 : i32, i32
  }
}

</mosaic_0001>

<bundles_post_ra>
// kernel: tpu_custom_call.1
= control target key start
LH: loop header
LB: loop body
LE: loop exit
PB: predicated region body
PF: predicated region fallthrough
CT: control target
= control target key end

     0   :  { %8 = vsyncpa [#allocation3], 0  ;;  %s667_s0 = inlined_call_operand.hbm [shape: bf16[128,128], index: 0, kind: input, shape index: {}]   ;;  %s668_s1 = inlined_call_operand.hbm [shape: bf16[128,128], index: 1, kind: input, shape index: {}]   ;;  %s669_s2 = inlined_call_operand.vmem [shape: f32[1,128], index: 2, kind: input, shape index: {}]   ;;  %s670_s3 = inlined_call_operand.hbm [shape: bf16[128,128], index: 3, kind: output, shape index: {}]  }
   0x1   :  { %9 = vsyncpa [#allocation6], 0 }
   0x2   :  { %10 = vsyncpa [#allocation4], 0  ;;  %s621_s12 = smov [#allocation2]  }
   0x3   :  { %s16_s13 = sshll.u32 %s621_s12, 4  ;;  %s17_s13 = int_to_ptr.vmem [resolvable:$true] %s16_s13 }
   0x4   :  { %s563_s14 = scalar_lea.vmem %s17_s13, 1024  ;;  %p568_p1 = scmp.lt.s32.totalorder %s17_s13, %s17_s13 }
   0x5   :  { %p564_p0 = scmp.ne.s32.totalorder %s17_s13, %s563_s14  ;;  %p569_p2 = scmp.lt.s32.totalorder %s563_s14, %s563_s14 }
   0x7   :  { %p570_p3 = por %p569_p2, %p568_p1 }
   0x9   :  { %p571_p4 = pnand %p570_p3, %p564_p0 }
   0xb   :  { %574 = shalt.err (!%p571_p4)
}
   0xc   :  { %s622_s15 = smov 64   ;;  %s623_s16 = smov 4  }
   0xd   :  { %22 = dma.hbm_to_vmem [thread:$0]  %s667_s0, 1024, %s17_s13, [#allocation3], %s622_s15, %s622_s15, %s623_s16  }
   0xe   :  { %s624_s19 = smov [#allocation5]  }
   0xf   :  { %s28_s20 = sshll.u32 %s624_s19, 4  ;;  %s29_s20 = int_to_ptr.vmem [resolvable:$true] %s28_s20 }
  0x10   :  { %s583_s21 = scalar_lea.vmem %s29_s20, 1024  ;;  %p588_p6 = scmp.lt.s32.totalorder %s29_s20, %s29_s20 }
  0x11   :  { %p584_p5 = scmp.ne.s32.totalorder %s29_s20, %s583_s21  ;;  %p589_p7 = scmp.lt.s32.totalorder %s583_s21, %s583_s21 }
  0x13   :  { %p590_p8 = por %p589_p7, %p588_p6 }
  0x15   :  { %p591_p9 = pnand %p590_p8, %p584_p5 }
  0x17   :  { %594 = shalt.err (!%p591_p9)
}
  0x18   :  { %34 = dma.hbm_to_vmem [thread:$0]  %s668_s1, 1024, %s29_s20, [#allocation6], %s622_s15, %s622_s15, %s623_s16  }
  0x19   :  { %615 = dma.done.wait [#allocation3], 1024  }
  0x1a   :  { %616 = vsyncadd [#allocation3], 4294966272 }
  0x1b   :  { %617 = dma.done.wait [#allocation6], 1024  }
  0x1c   :  { %618 = vsyncadd [#allocation6], 4294966272  ;;  %v539_v0 = vld [vmem:[#allocation5 + $0x38] sm:$0xff]   ;;  %v540_v1 = vld [vmem:[#allocation5 + $0x30] sm:$0xff]  }
  0x1d   :  { %486 = vmatprep.subr.bf16.mxu0 %v539_v0  ;;  %518 = vmatprep.subr.bf16.mxu1 %v539_v0  ;;  %v541_v2 = vld [vmem:[#allocation5 + $0x28] sm:$0xff]   ;;  %v542_v3 = vld [vmem:[#allocation5 + $0x20] sm:$0xff]   ;;  %v543_v6 = vld [vmem:[#allocation5 + $0x18] sm:$0xff]  }
  0x1e   :  { %487 = vmatpush3.bf16.msra.mxu0 %v539_v0  ;;  %526 = vmatpush3.bf16.msra.mxu1 %v539_v0  ;;  %v547_v4 = vld [vmem:[#allocation2] sm:$0xff]   ;;  %v544_v7 = vld [vmem:[#allocation5 + $0x10] sm:$0xff]   ;;  %v545_v8 = vld [vmem:[#allocation5 + $0x8] sm:$0xff]  }
  0x1f   :  { %488 = vmatprep.subr.bf16.mxu0 %v540_v1  ;;  %519 = vmatprep.subr.bf16.mxu1 %v540_v1  ;;  %v548_v5 = vld [vmem:[#allocation2 + $0x20] sm:$0xff]   ;;  %v549_v10 = vld [vmem:[#allocation2 + $0x8] sm:$0xff]   ;;  %v551_v12 = vld [vmem:[#allocation2 + $0x10] sm:$0xff]  }
  0x20   :  { %502 = vmatprep.mubr.bf16.mxu0 %v547_v4  ;;  %510 = vmatprep.mubr.bf16.mxu1 %v548_v5  ;;  %v546_v9 = vld [vmem:[#allocation5] sm:$0xff]   ;;  %v550_v11 = vld [vmem:[#allocation2 + $0x28] sm:$0xff]   ;;  %v552_v13 = vld [vmem:[#allocation2 + $0x30] sm:$0xff]  }
  0x21   :  { %v553_v14 = vld [vmem:[#allocation2 + $0x18] sm:$0xff]   ;;  %v374_v18 = vld [vmem:[%s669_s2] ss:$0 sm:$0xff]  ;;  %s625_s2 = smov [#allocation7]  }
  0x22   :  { %489 = vmatpush3.bf16.msra.mxu0 %v540_v1  ;;  %527 = vmatpush3.bf16.msra.mxu1 %v540_v1  ;;  %v554_v15 = vld [vmem:[#allocation2 + $0x38] sm:$0xff]   ;;  %s361_s24 = sshll.u32 %s625_s2, 4  ;;  %s362_s24 = int_to_ptr.vmem [resolvable:$true] %s361_s24 }
  0x23   :  { %490 = vmatprep.subr.bf16.mxu0 %v541_v2  ;;  %520 = vmatprep.subr.bf16.mxu1 %v541_v2  ;;  %s595_s25 = scalar_lea.vmem %s362_s24, 1024  ;;  %p600_p11 = scmp.lt.s32.totalorder %s362_s24, %s362_s24 }
  0x24   :  { %p596_p10 = scmp.ne.s32.totalorder %s362_s24, %s595_s25  ;;  %p601_p12 = scmp.lt.s32.totalorder %s595_s25, %s595_s25 }
  0x26   :  { %491 = vmatpush3.bf16.msra.mxu0 %v541_v2  ;;  %528 = vmatpush3.bf16.msra.mxu1 %v541_v2  ;;  %p602_p13 = por %p601_p12, %p600_p11 }
  0x27   :  { %492 = vmatprep.subr.bf16.mxu0 %v542_v3  ;;  %521 = vmatprep.subr.bf16.mxu1 %v542_v3 }
  0x28   :  { %p603_p0 = pnand %p602_p13, %p596_p10 }
  0x2a   :  { %493 = vmatpush3.bf16.msra.mxu0 %v542_v3  ;;  %529 = vmatpush3.bf16.msra.mxu1 %v542_v3 }
  0x2b   :  { %494 = vmatprep.subr.bf16.mxu0 %v543_v6  ;;  %522 = vmatprep.subr.bf16.mxu1 %v543_v6 }
  0x2e   :  { %495 = vmatpush3.bf16.msra.mxu0 %v543_v6  ;;  %530 = vmatpush3.bf16.msra.mxu1 %v543_v6 }
  0x2f   :  { %496 = vmatprep.subr.bf16.mxu0 %v544_v7  ;;  %523 = vmatprep.subr.bf16.mxu1 %v544_v7 }
  0x32   :  { %497 = vmatpush3.bf16.msra.mxu0 %v544_v7  ;;  %531 = vmatpush3.bf16.msra.mxu1 %v544_v7 }
  0x33   :  { %498 = vmatprep.subr.bf16.mxu0 %v545_v8  ;;  %524 = vmatprep.subr.bf16.mxu1 %v545_v8 }
  0x36   :  { %499 = vmatpush3.bf16.msra.mxu0 %v545_v8  ;;  %532 = vmatpush3.bf16.msra.mxu1 %v545_v8 }
  0x37   :  { %500 = vmatprep.subr.bf16.mxu0 %v546_v9  ;;  %525 = vmatprep.subr.bf16.mxu1 %v546_v9 }
  0x3a   :  { %501 = vmatpush3.bf16.msra.mxu0 %v546_v9  ;;  %533 = vmatpush3.bf16.msra.mxu1 %v546_v9 }
  0x3d   :  { %503 = vmatmul.mubr.bf16.vlgmr.msra.gmra.mxu0 %v549_v10  ;;  %511 = vmatmul.mubr.bf16.vlgmr.msra.gmra.mxu1 %v550_v11 }
  0x3e   :  { %506 = vmatprep.mubr.bf16.mxu0 %v551_v12  ;;  %514 = vmatprep.mubr.bf16.mxu1 %v552_v13 }
  0x45   :  { %507 = vmatmul.mubr.bf16.gmra.mxu0 %v553_v14  ;;  %515 = vmatmul.mubr.bf16.gmra.mxu1 %v554_v15 }
  0xfd   :  { %v504_v16 = vpop.f32.mrf.mxu0  ;;  %v512_v17 = vpop.f32.mrf.mxu1 }
  0xfe   :  { %v222_v23 = vadd.f32 %v504_v16, %v374_v18  ;;  %v254_v24 = vadd.f32 %v512_v17, %v374_v18 }
  0xff   :  { %v213_v19 = vpop.f32.mrf.mxu0  ;;  %v245_v20 = vpop.f32.mrf.mxu1 }
 0x100   :  { %v214_v27 = vadd.f32 %v374_v18, %v213_v19  ;;  %v246_v28 = vadd.f32 %v374_v18, %v245_v20 }
 0x101   :  { %v505_v21 = vpop.f32.mrf.mxu0  ;;  %v513_v22 = vpop.f32.mrf.mxu1 }
 0x102   :  { %v225_v25 = vadd.f32 %v505_v21, %v374_v18  ;;  %v257_v26 = vadd.f32 %v513_v22, %v374_v18 }
 0x103   :  { %v216_v29 = vpop.f32.mrf.mxu0  ;;  %v248_v30 = vpop.f32.mrf.mxu1 }
 0x104   :  { %v431_v31 = vpack.c.bf16 %v225_v25, %v222_v23  ;;  %v451_v32 = vpack.c.bf16 %v257_v26, %v254_v24  ;;  %v217_v33 = vadd.f32 %v374_v18, %v216_v29  ;;  %v249_v34 = vadd.f32 %v374_v18, %v248_v30 }
 0x105   :  { %v508_v35 = vpop.f32.mrf.mxu0  ;;  %v516_v36 = vpop.f32.mrf.mxu1 }
 0x106   :  { %463 = vst [vmem:[#allocation7 + $0x8] sm:$0xff] %v431_v31   ;;  %467 = vst [vmem:[#allocation7 + $0x28] sm:$0xff] %v451_v32   ;;  %v426_v37 = vpack.c.bf16 %v217_v33, %v214_v27  ;;  %v446_v38 = vpack.c.bf16 %v249_v34, %v246_v28  ;;  %v238_v43 = vadd.f32 %v508_v35, %v374_v18 }
 0x107   :  { %v229_v39 = vpop.f32.mrf.mxu0  ;;  %v261_v40 = vpop.f32.mrf.mxu1  ;;  %v270_v44 = vadd.f32 %v516_v36, %v374_v18 }
 0x108   :  { %427 = vst [vmem:[#allocation7] sm:$0xff] %v426_v37   ;;  %466 = vst [vmem:[#allocation7 + $0x20] sm:$0xff] %v446_v38   ;;  %v230_v47 = vadd.f32 %v374_v18, %v229_v39  ;;  %v262_v48 = vadd.f32 %v374_v18, %v261_v40 }
 0x109   :  { %v509_v41 = vpop.f32.mrf.mxu0  ;;  %v517_v42 = vpop.f32.mrf.mxu1 }
 0x10a   :  { %v241_v45 = vadd.f32 %v509_v41, %v374_v18  ;;  %v273_v46 = vadd.f32 %v517_v42, %v374_v18 }
 0x10b   :  { %v232_v49 = vpop.f32.mrf.mxu0  ;;  %v264_v50 = vpop.f32.mrf.mxu1 }
 0x10c   :  { %v441_v51 = vpack.c.bf16 %v241_v45, %v238_v43  ;;  %v461_v52 = vpack.c.bf16 %v273_v46, %v270_v44  ;;  %v233_v53 = vadd.f32 %v374_v18, %v232_v49  ;;  %v265_v54 = vadd.f32 %v374_v18, %v264_v50 }
 0x10e   :  { %465 = vst [vmem:[#allocation7 + $0x18] sm:$0xff] %v441_v51   ;;  %469 = vst [vmem:[#allocation7 + $0x38] sm:$0xff] %v461_v52   ;;  %v436_v55 = vpack.c.bf16 %v233_v53, %v230_v47  ;;  %v456_v56 = vpack.c.bf16 %v265_v54, %v262_v48 }
 0x110   :  { %464 = vst [vmem:[#allocation7 + $0x10] sm:$0xff] %v436_v55   ;;  %468 = vst [vmem:[#allocation7 + $0x30] sm:$0xff] %v456_v56  }
 0x111   :  { %606 = shalt.err (!%p603_p0)
}
 0x112   :  { %367 = dma.vmem_to_hbm [thread:$0]  %s362_s24, 1024, %s670_s3, [#allocation4], %s622_s15, %s622_s15, %s623_s16  }
 0x113   :  { %619 = dma.done.wait [#allocation4], 1024  }
 0x114   :  { %620 = vsyncadd [#allocation4], 4294966272 }
 0x115   :  { %371 = vsyncpa [#allocation3], 1 }
 0x116   :  { %372 = vsyncpa [#allocation6], 1 }
 0x117   :  { %373 = vsyncpa [#allocation4], 1 }

</bundles_post_ra>
